<compile_context>
chip_gen: v6e
topology: v6e:2x2x1
jax: 0.10.0
libtpu: 0.0.40
codegen_flags: <defaults>
</compile_context>

<pallas_src>
import functools

import jax
import jax.numpy as jnp
from jax.experimental import pallas as pl
from jax.experimental.pallas import tpu as pltpu

EPS = 1e-5
MAXPAD = 3     # halo of the largest (7x7) kernel
KSIZE = 7


# ---------------------------------------------------------------------------
# Kernel 1: fused multi-scale conv (row-grouped matmuls) + per-image BN partials.
# ---------------------------------------------------------------------------
def _conv_kernel(x_ref, w_ref, y_ref, stats_ref, xcol_ref, *, H, W):
    # x_ref    : (1, Cin, L)       NCHW-flat input block, L = H*W (no wrapper transpose)
    # w_ref    : (7, C3, 7*Cin)    row-grouped fused weights: w[dy, co, dx*Cin + ci]
    # y_ref    : (1, C3, L)        pre-BN conv output, NCHW-flat (lane-dense stores)
    # stats_ref: (1, C3, 2)        per-image [sum ; centered sum-of-squares]
    # xcol_ref : (7*Cin, L6) VMEM  dx-grouped operand, L6 = (H+6)*W
    Cin = x_ref.shape[1]
    L = H * W
    L6 = (H + 2 * MAXPAD) * W
    lead = MAXPAD * W + MAXPAD            # 3 padding rows + 3 flat guard zeros

    # Row-padded flat input with +-3 guard zeros at both flat ends; only the halo is
    # "zeroed" (it comes from the concatenated zero blocks), the interior is the input.
    x0 = x_ref[0]                                            # (Cin, L)
    zpad = jnp.zeros((Cin, lead), jnp.float32)
    xrp = jnp.concatenate([zpad, x0, zpad], axis=1)          # (Cin, L6 + 6)

    # Build the dx-grouped operand:
    #   xcol[dx*Cin + ci, q] = x value at flat position q shifted by (dx - 3) columns,
    # with columns that fall outside the image masked to zero (row padding is already
    # materialized; the +-3 guard zeros absorb the flat over/under-run at the ends).
    # These 7 input-sized masked copies are the only relayout work in the kernel.
    col = jax.lax.broadcasted_iota(jnp.int32, (1, L6), 1) % W
    for dx in range(KSIZE):
        shifted = xrp[:, dx:dx + L6]                         # (Cin, L6) static lane slice
        ok = (col >= MAXPAD - dx) & (col < W + MAXPAD - dx)
        xcol_ref[dx * Cin:(dx + 1) * Cin, :] = jnp.where(ok, shifted, 0.0)

    # 7 MXU calls per image with K = 7*Cin; every operand is a direct ref slice and the
    # accumulator is (C3, L) so the result is already NCHW-flat (no final transpose).
    # The first matmul initializes the accumulator (no zero-fill pass).
    # TODO(synk): bf16 operands (f32 accumulate) give 2-4x MXU throughput on v5e/v6e/v7x
    #             but change numerics vs the f32 PyTorch reference.
    acc = jnp.dot(w_ref[0], xcol_ref[:, 0:L],
                  preferred_element_type=jnp.float32)        # (C3, L)
    for dy in range(1, KSIZE):
        acc = acc + jnp.dot(w_ref[dy], xcol_ref[:, dy * W:dy * W + L],
                            preferred_element_type=jnp.float32)

    y_ref[...] = acc[None].astype(y_ref.dtype)

    # Per-image BN partials with a per-image shift (centered sums): numerically robust
    # vs E[y^2]-E[y]^2, and keeps the batch grid axis "parallel" (reduced in the wrapper).
    s = jnp.sum(acc, axis=1, keepdims=True)                  # (C3, 1)
    centered = acc - s * (1.0 / L)
    m2 = jnp.sum(centered * centered, axis=1, keepdims=True) # (C3, 1)
    stats_ref[...] = jnp.concatenate([s, m2], axis=1)[None]  # (1, C3, 2)


# ---------------------------------------------------------------------------
# Kernel 2: elementwise batch-norm apply  out = y * scale + shift   (NCHW-flat)
# ---------------------------------------------------------------------------
def _bn_kernel(y_ref, scale_ref, shift_ref, o_ref):
    # y_ref/o_ref: (1, C3, TL)   scale/shift: (1, C3, 1) broadcast along lanes
    o_ref[...] = y_ref[...] * scale_ref[...] + shift_ref[...]


def _pick_lane_tile(length, rows, target_bytes=8 << 20):
    """Largest lane tile (full length, or a multiple of 128 dividing `length`) whose
    (rows x tile) f32 block stays around `target_bytes` (multi-MiB blocks amortize the
    ~0.35us per-grid-step overhead)."""
    if length * rows * 4 <= target_bytes:
        return length
    max_lanes = max(128, ((target_bytes // (rows * 4)) // 128) * 128)
    start = min(max_lanes, (length // 128) * 128)
    for t in range(start, 0, -128):
        if length % t == 0:
            return t
    return length


def multi_scale_conv(x_nchw, w3, w5, w7, b3, b5, b7, gamma, beta, eps=EPS):
    """MultiScaleConv forward. x_nchw: (N, Cin, H, W) -> (N, 3*Cout, H, W).

    Matches the PyTorch module in training mode: per-branch 'same' conv, channel concat
    [3x3 | 5x5 | 7x7], BatchNorm2d with batch statistics (biased variance, eps=1e-5).
    The conv biases are accepted for API parity but not applied: a constant per-channel
    shift cancels exactly under *training-mode* BN (do not reuse with eval-mode BN or
    consume the pre-BN tensor elsewhere).
    """
    del b3, b5, b7  # cancels exactly under training-mode BN (saves a VPU add + a DMA)

    N, Cin, H, W = x_nchw.shape
    Cout = w3.shape[-1]
    C3 = 3 * Cout
    L = H * W
    L6 = (H + 2 * MAXPAD) * W
    K7 = KSIZE * Cin

    # NCHW-flat view of the input: metadata-only reshape, no HBM transpose pass.
    x = x_nchw.reshape(N, Cin, L).astype(jnp.float32)

    # Fuse the three branches along Cout (zero taps contribute nothing) and regroup by
    # kernel row:  w_row[dy, co, dx*Cin + ci] = w[dy, dx, ci, co]  ->  K = 7*Cin per matmul.
    w3p = jnp.pad(w3, ((2, 2), (2, 2), (0, 0), (0, 0)))
    w5p = jnp.pad(w5, ((1, 1), (1, 1), (0, 0), (0, 0)))
    w_cat = jnp.concatenate([w3p, w5p, w7], axis=-1)                       # (7,7,Cin,C3)
    w_row = jnp.transpose(w_cat, (0, 3, 1, 2)).reshape(KSIZE, C3, K7).astype(jnp.float32)

    # Rough per-core VMEM need (double-buffered blocks + scratch + live values) + headroom.
    block_bytes = 4 * (2 * Cin * L + 2 * KSIZE * C3 * K7 + 2 * C3 * L + 2 * C3 * 2)
    scratch_bytes = 4 * (K7 * L6)
    value_bytes = 4 * (Cin * (L6 + 2 * MAXPAD) + C3 * L + K7 * L)
    vmem_limit = int(min(max(2 * (block_bytes + scratch_bytes + value_bytes) + (4 << 20),
                             32 << 20), 96 << 20))

    y, stats = pl.pallas_call(
        functools.partial(_conv_kernel, H=H, W=W),
        out_shape=(
            jax.ShapeDtypeStruct((N, C3, L), jnp.float32),   # pre-BN, NCHW-flat
            jax.ShapeDtypeStruct((N, C3, 2), jnp.float32),   # per-image [sum, centered SS]
        ),
        grid_spec=pltpu.PrefetchScalarGridSpec(
            num_scalar_prefetch=0,
            grid=(N,),
            in_specs=[
                pl.BlockSpec((1, Cin, L), lambda i: (i, 0, 0)),
                pl.BlockSpec((KSIZE, C3, K7), lambda i: (0, 0, 0)),
            ],
            out_specs=[
                pl.BlockSpec((1, C3, L), lambda i: (i, 0, 0)),
                pl.BlockSpec((1, C3, 2), lambda i: (i, 0, 0)),
            ],
            scratch_shapes=[
                pltpu.VMEM((K7, L6), jnp.float32),
            ],
        ),
        compiler_params=pltpu.CompilerParams(
            dimension_semantics=("parallel",),   # stats are per-image partials
            vmem_limit_bytes=vmem_limit,
        ),
    )(x, w_row)
    # TODO(synk): for production H/W (e.g. 224x224, Cin>=64) tile H with a 3-row halo
    #             (grid=(N, H//TH)) so the dx-grouped operand fits v7x's 64 MiB VMEM.

    # Training-mode BatchNorm statistics (biased variance) combined from per-image
    # centered partials (exact parallel-variance identity; no E[y^2]-E[y]^2 cancellation).
    cnt = jnp.float32(N * L)
    s_i = stats[:, :, 0]                       # (N, C3) per-image sums
    m2_i = stats[:, :, 1]                      # (N, C3) per-image centered sum-of-squares
    mean_i = s_i / jnp.float32(L)
    mean = jnp.sum(s_i, axis=0) / cnt
    var = (jnp.sum(m2_i, axis=0)
           + jnp.float32(L) * jnp.sum((mean_i - mean) ** 2, axis=0)) / cnt
    scale = gamma.astype(jnp.float32) / jnp.sqrt(var + eps)
    shift = beta.astype(jnp.float32) - mean * scale

    # TODO(synk): storing y in bf16 halves the HBM traffic of this mem-bound pass but
    #             perturbs numerics vs the f32 PyTorch reference, so it stays f32.
    tl = _pick_lane_tile(L, C3)
    out_flat = pl.pallas_call(
        _bn_kernel,
        out_shape=jax.ShapeDtypeStruct((N, C3, L), jnp.float32),
        grid_spec=pltpu.PrefetchScalarGridSpec(
            num_scalar_prefetch=0,
            grid=(N, L // tl),
            in_specs=[
                pl.BlockSpec((1, C3, tl), lambda i, j: (i, 0, j)),
                pl.BlockSpec((1, C3, 1), lambda i, j: (0, 0, 0)),
                pl.BlockSpec((1, C3, 1), lambda i, j: (0, 0, 0)),
            ],
            out_specs=pl.BlockSpec((1, C3, tl), lambda i, j: (i, 0, j)),
        ),
        compiler_params=pltpu.CompilerParams(
            dimension_semantics=("parallel", "parallel"),
        ),
    )(y, scale.reshape(1, C3, 1), shift.reshape(1, C3, 1))

    # NCHW-flat is already the output memory layout -> this reshape is free.
    return out_flat.reshape(N, C3, H, W)


# ---------------------------------------------------------------------------
# Pure-JAX reference for correctness checking (includes the biases; they cancel).
# ---------------------------------------------------------------------------
def _ref_forward(x_nchw, w3, w5, w7, b3, b5, b7, gamma, beta, eps=EPS):
    x = jnp.transpose(x_nchw, (0, 2, 3, 1)).astype(jnp.float32)

    def conv(w, b, pad):
        y = jax.lax.conv_general_dilated(
            x, w, window_strides=(1, 1), padding=[(pad, pad), (pad, pad)],
            dimension_numbers=("NHWC", "HWIO", "NHWC"),
        )
        return y + b

    y = jnp.concatenate([conv(w3, b3, 1), conv(w5, b5, 2), conv(w7, b7, 3)], axis=-1)
    mean = jnp.mean(y, axis=(0, 1, 2))
    var = jnp.var(y, axis=(0, 1, 2))
    y = (y - mean) / jnp.sqrt(var + eps) * gamma + beta
    return jnp.transpose(y, (0, 3, 1, 2))


if __name__ == "__main__":
    key = jax.random.PRNGKey(0)
    N, Cin, H, W = 2, 4, 16, 16
    Cout = 4

    ks = jax.random.split(key, 10)
    x = jax.random.normal(ks[0], (N, Cin, H, W), jnp.float32)
    w3 = 0.1 * jax.random.normal(ks[1], (3, 3, Cin, Cout), jnp.float32)
    w5 = 0.1 * jax.random.normal(ks[2], (5, 5, Cin, Cout), jnp.float32)
    w7 = 0.1 * jax.random.normal(ks[3], (7, 7, Cin, Cout), jnp.float32)
    b3 = 0.1 * jax.random.normal(ks[4], (Cout,), jnp.float32)
    b5 = 0.1 * jax.random.normal(ks[5], (Cout,), jnp.float32)
    b7 = 0.1 * jax.random.normal(ks[6], (Cout,), jnp.float32)
    gamma = 1.0 + 0.1 * jax.random.normal(ks[7], (3 * Cout,), jnp.float32)
    beta = 0.1 * jax.random.normal(ks[8], (3 * Cout,), jnp.float32)

    out = multi_scale_conv(x, w3, w5, w7, b3, b5, b7, gamma, beta)
    out = jax.block_until_ready(out)

    ref = _ref_forward(x, w3, w5, w7, b3, b5, b7, gamma, beta)
    assert out.shape == (N, 3 * Cout, H, W), out.shape
    assert jnp.allclose(out, ref, rtol=1e-4, atol=2e-4), float(jnp.max(jnp.abs(out - ref)))

    print("KERNEL_OK")
</pallas_src>

<mosaic_0001>
module attributes {stable_mosaic.version = 11 : i64} {
  func.func @_conv_kernel(%arg0: i32, %arg1: memref<1x4x256xf32, #tpu.memory_space<vmem>>, %arg2: memref<7x12x28xf32, #tpu.memory_space<vmem>>, %arg3: memref<1x12x256xf32, #tpu.memory_space<vmem>>, %arg4: memref<1x12x2xf32, #tpu.memory_space<vmem>>, %arg5: memref<28x352xf32, #tpu.memory_space<vmem>>) attributes {dimension_semantics = [#tpu.dimension_semantics<parallel>], iteration_bounds = array<i64: 2>, scalar_prefetch = 0 : i64, scratch_operands = 1 : i64, tpu.core_type = #tpu.core_type<tc>, window_params = [{transform_indices = @transform_0, window_bounds = array<i64: 1, 4, 256>}, {pipeline_mode = #tpu.pipeline_mode<synchronous>, transform_indices = @transform_1, window_bounds = array<i64: 7, 12, 28>}, {transform_indices = @transform_2, window_bounds = array<i64: 1, 12, 256>}, {transform_indices = @transform_3, window_bounds = array<i64: 1, 12, 2>}]} {
    %c0 = arith.constant 0 : index
    %c0_0 = arith.constant 0 : index
    %c0_1 = arith.constant 0 : index
    %0 = vector.load %arg1[%c0, %c0_0, %c0_1] : memref<1x4x256xf32, #tpu.memory_space<vmem>>, vector<1x4x256xf32>
    %1 = vector.shape_cast %0 : vector<1x4x256xf32> to vector<4x256xf32>
    %cst = arith.constant 0.000000e+00 : f32
    %2 = vector.broadcast %cst : f32 to vector<4x51xf32>
    %3 = tpu.concatenate %2, %1, %2 in 1 : vector<4x51xf32>, vector<4x256xf32>, vector<4x51xf32> -> vector<4x358xf32>
    %4 = tpu.iota {dimensions = array<i32: 1>} : vector<1x352xi32>
    %c16_i32 = arith.constant 16 : i32
    %c0_i32 = arith.constant 0 : i32
    %5 = arith.cmpi eq, %c16_i32, %c0_i32 : i32
    %c1_i32 = arith.constant 1 : i32
    %6 = arith.select %5, %c1_i32, %c16_i32 : i32
    %7 = vector.broadcast %6 : i32 to vector<1x352xi32>
    %8 = arith.remsi %4, %7 : vector<1x352xi32>
    %c0_i32_2 = arith.constant 0 : i32
    %9 = vector.broadcast %c0_i32_2 : i32 to vector<1x352xi32>
    %10 = arith.cmpi ne, %8, %9 : vector<1x352xi32>
    %c0_i32_3 = arith.constant 0 : i32
    %11 = vector.broadcast %c0_i32_3 : i32 to vector<1x352xi32>
    %12 = arith.cmpi slt, %8, %11 : vector<1x352xi32>
    %c0_i32_4 = arith.constant 0 : i32
    %13 = arith.cmpi slt, %6, %c0_i32_4 : i32
    %14 = vector.broadcast %13 : i1 to vector<1x352xi1>
    %15 = vector.broadcast %14 : vector<1x352xi1> to vector<1x352xi1>
    %16 = arith.xori %12, %15 : vector<1x352xi1>
    %17 = arith.andi %16, %10 : vector<1x352xi1>
    %18 = vector.broadcast %6 : i32 to vector<1x352xi32>
    %19 = arith.addi %8, %18 : vector<1x352xi32>
    %20 = arith.select %17, %19, %8 : vector<1x352xi1>, vector<1x352xi32>
    %21 = vector.extract_strided_slice %3 {offsets = [0, 0], sizes = [4, 352], strides = [1, 1]} : vector<4x358xf32> to vector<4x352xf32>
    %c3_i32 = arith.constant 3 : i32
    %22 = vector.broadcast %c3_i32 : i32 to vector<1x352xi32>
    %23 = arith.cmpi sge, %20, %22 : vector<1x352xi32>
    %c19_i32 = arith.constant 19 : i32
    %24 = vector.broadcast %c19_i32 : i32 to vector<1x352xi32>
    %25 = arith.cmpi slt, %20, %24 : vector<1x352xi32>
    %26 = arith.andi %23, %25 : vector<1x352xi1>
    %cst_5 = arith.constant 0.000000e+00 : f32
    %27 = vector.shape_cast %26 : vector<1x352xi1> to vector<1x352xi1>
    %28 = vector.broadcast %27 : vector<1x352xi1> to vector<4x352xi1>
    %29 = vector.broadcast %cst_5 : f32 to vector<4x352xf32>
    %30 = arith.select %28, %21, %29 : vector<4x352xi1>, vector<4x352xf32>
    %c0_6 = arith.constant 0 : index
    %c0_7 = arith.constant 0 : index
    %31 = vector.load %arg5[%c0_6, %c0_7] : memref<28x352xf32, #tpu.memory_space<vmem>>, vector<4x352xf32>
    tpu.vector_store %arg5[%c0_6, %c0_7], %30 {strides = array<i32>} : memref<28x352xf32, #tpu.memory_space<vmem>>, vector<4x352xf32>,
    %32 = vector.extract_strided_slice %3 {offsets = [0, 1], sizes = [4, 352], strides = [1, 1]} : vector<4x358xf32> to vector<4x352xf32>
    %c2_i32 = arith.constant 2 : i32
    %33 = vector.broadcast %c2_i32 : i32 to vector<1x352xi32>
    %34 = arith.cmpi sge, %20, %33 : vector<1x352xi32>
    %c18_i32 = arith.constant 18 : i32
    %35 = vector.broadcast %c18_i32 : i32 to vector<1x352xi32>
    %36 = arith.cmpi slt, %20, %35 : vector<1x352xi32>
    %37 = arith.andi %34, %36 : vector<1x352xi1>
    %cst_8 = arith.constant 0.000000e+00 : f32
    %38 = vector.shape_cast %37 : vector<1x352xi1> to vector<1x352xi1>
    %39 = vector.broadcast %38 : vector<1x352xi1> to vector<4x352xi1>
    %40 = vector.broadcast %cst_8 : f32 to vector<4x352xf32>
    %41 = arith.select %39, %32, %40 : vector<4x352xi1>, vector<4x352xf32>
    %c4 = arith.constant 4 : index
    %c0_9 = arith.constant 0 : index
    %42 = vector.load %arg5[%c4, %c0_9] : memref<28x352xf32, #tpu.memory_space<vmem>>, vector<4x352xf32>
    tpu.vector_store %arg5[%c4, %c0_9], %41 {strides = array<i32>} : memref<28x352xf32, #tpu.memory_space<vmem>>, vector<4x352xf32>,
    %43 = vector.extract_strided_slice %3 {offsets = [0, 2], sizes = [4, 352], strides = [1, 1]} : vector<4x358xf32> to vector<4x352xf32>
    %c1_i32_10 = arith.constant 1 : i32
    %44 = vector.broadcast %c1_i32_10 : i32 to vector<1x352xi32>
    %45 = arith.cmpi sge, %20, %44 : vector<1x352xi32>
    %c17_i32 = arith.constant 17 : i32
    %46 = vector.broadcast %c17_i32 : i32 to vector<1x352xi32>
    %47 = arith.cmpi slt, %20, %46 : vector<1x352xi32>
    %48 = arith.andi %45, %47 : vector<1x352xi1>
    %cst_11 = arith.constant 0.000000e+00 : f32
    %49 = vector.shape_cast %48 : vector<1x352xi1> to vector<1x352xi1>
    %50 = vector.broadcast %49 : vector<1x352xi1> to vector<4x352xi1>
    %51 = vector.broadcast %cst_11 : f32 to vector<4x352xf32>
    %52 = arith.select %50, %43, %51 : vector<4x352xi1>, vector<4x352xf32>
    %c8 = arith.constant 8 : index
    %c0_12 = arith.constant 0 : index
    %53 = vector.load %arg5[%c8, %c0_12] : memref<28x352xf32, #tpu.memory_space<vmem>>, vector<4x352xf32>
    tpu.vector_store %arg5[%c8, %c0_12], %52 {strides = array<i32>} : memref<28x352xf32, #tpu.memory_space<vmem>>, vector<4x352xf32>,
    %54 = vector.extract_strided_slice %3 {offsets = [0, 3], sizes = [4, 352], strides = [1, 1]} : vector<4x358xf32> to vector<4x352xf32>
    %c0_i32_13 = arith.constant 0 : i32
    %55 = vector.broadcast %c0_i32_13 : i32 to vector<1x352xi32>
    %56 = arith.cmpi sge, %20, %55 : vector<1x352xi32>
    %c16_i32_14 = arith.constant 16 : i32
    %57 = vector.broadcast %c16_i32_14 : i32 to vector<1x352xi32>
    %58 = arith.cmpi slt, %20, %57 : vector<1x352xi32>
    %59 = arith.andi %56, %58 : vector<1x352xi1>
    %cst_15 = arith.constant 0.000000e+00 : f32
    %60 = vector.shape_cast %59 : vector<1x352xi1> to vector<1x352xi1>
    %61 = vector.broadcast %60 : vector<1x352xi1> to vector<4x352xi1>
    %62 = vector.broadcast %cst_15 : f32 to vector<4x352xf32>
    %63 = arith.select %61, %54, %62 : vector<4x352xi1>, vector<4x352xf32>
    %c12 = arith.constant 12 : index
    %c0_16 = arith.constant 0 : index
    %64 = vector.load %arg5[%c12, %c0_16] : memref<28x352xf32, #tpu.memory_space<vmem>>, vector<4x352xf32>
    tpu.vector_store %arg5[%c12, %c0_16], %63 {strides = array<i32>} : memref<28x352xf32, #tpu.memory_space<vmem>>, vector<4x352xf32>,
    %65 = vector.extract_strided_slice %3 {offsets = [0, 4], sizes = [4, 352], strides = [1, 1]} : vector<4x358xf32> to vector<4x352xf32>
    %c-1_i32 = arith.constant -1 : i32
    %66 = vector.broadcast %c-1_i32 : i32 to vector<1x352xi32>
    %67 = arith.cmpi sge, %20, %66 : vector<1x352xi32>
    %c15_i32 = arith.constant 15 : i32
    %68 = vector.broadcast %c15_i32 : i32 to vector<1x352xi32>
    %69 = arith.cmpi slt, %20, %68 : vector<1x352xi32>
    %70 = arith.andi %67, %69 : vector<1x352xi1>
    %cst_17 = arith.constant 0.000000e+00 : f32
    %71 = vector.shape_cast %70 : vector<1x352xi1> to vector<1x352xi1>
    %72 = vector.broadcast %71 : vector<1x352xi1> to vector<4x352xi1>
    %73 = vector.broadcast %cst_17 : f32 to vector<4x352xf32>
    %74 = arith.select %72, %65, %73 : vector<4x352xi1>, vector<4x352xf32>
    %c16 = arith.constant 16 : index
    %c0_18 = arith.constant 0 : index
    %75 = vector.load %arg5[%c16, %c0_18] : memref<28x352xf32, #tpu.memory_space<vmem>>, vector<4x352xf32>
    tpu.vector_store %arg5[%c16, %c0_18], %74 {strides = array<i32>} : memref<28x352xf32, #tpu.memory_space<vmem>>, vector<4x352xf32>,
    %76 = vector.extract_strided_slice %3 {offsets = [0, 5], sizes = [4, 352], strides = [1, 1]} : vector<4x358xf32> to vector<4x352xf32>
    %c-2_i32 = arith.constant -2 : i32
    %77 = vector.broadcast %c-2_i32 : i32 to vector<1x352xi32>
    %78 = arith.cmpi sge, %20, %77 : vector<1x352xi32>
    %c14_i32 = arith.constant 14 : i32
    %79 = vector.broadcast %c14_i32 : i32 to vector<1x352xi32>
    %80 = arith.cmpi slt, %20, %79 : vector<1x352xi32>
    %81 = arith.andi %78, %80 : vector<1x352xi1>
    %cst_19 = arith.constant 0.000000e+00 : f32
    %82 = vector.shape_cast %81 : vector<1x352xi1> to vector<1x352xi1>
    %83 = vector.broadcast %82 : vector<1x352xi1> to vector<4x352xi1>
    %84 = vector.broadcast %cst_19 : f32 to vector<4x352xf32>
    %85 = arith.select %83, %76, %84 : vector<4x352xi1>, vector<4x352xf32>
    %c20 = arith.constant 20 : index
    %c0_20 = arith.constant 0 : index
    %86 = vector.load %arg5[%c20, %c0_20] : memref<28x352xf32, #tpu.memory_space<vmem>>, vector<4x352xf32>
    tpu.vector_store %arg5[%c20, %c0_20], %85 {strides = array<i32>} : memref<28x352xf32, #tpu.memory_space<vmem>>, vector<4x352xf32>,
    %87 = vector.extract_strided_slice %3 {offsets = [0, 6], sizes = [4, 352], strides = [1, 1]} : vector<4x358xf32> to vector<4x352xf32>
    %c-3_i32 = arith.constant -3 : i32
    %88 = vector.broadcast %c-3_i32 : i32 to vector<1x352xi32>
    %89 = arith.cmpi sge, %20, %88 : vector<1x352xi32>
    %c13_i32 = arith.constant 13 : i32
    %90 = vector.broadcast %c13_i32 : i32 to vector<1x352xi32>
    %91 = arith.cmpi slt, %20, %90 : vector<1x352xi32>
    %92 = arith.andi %89, %91 : vector<1x352xi1>
    %cst_21 = arith.constant 0.000000e+00 : f32
    %93 = vector.shape_cast %92 : vector<1x352xi1> to vector<1x352xi1>
    %94 = vector.broadcast %93 : vector<1x352xi1> to vector<4x352xi1>
    %95 = vector.broadcast %cst_21 : f32 to vector<4x352xf32>
    %96 = arith.select %94, %87, %95 : vector<4x352xi1>, vector<4x352xf32>
    %c24 = arith.constant 24 : index
    %c0_22 = arith.constant 0 : index
    %97 = vector.load %arg5[%c24, %c0_22] : memref<28x352xf32, #tpu.memory_space<vmem>>, vector<4x352xf32>
    tpu.vector_store %arg5[%c24, %c0_22], %96 {strides = array<i32>} : memref<28x352xf32, #tpu.memory_space<vmem>>, vector<4x352xf32>,
    %c0_23 = arith.constant 0 : index
    %c0_24 = arith.constant 0 : index
    %c0_25 = arith.constant 0 : index
    %98 = vector.load %arg2[%c0_23, %c0_24, %c0_25] : memref<7x12x28xf32, #tpu.memory_space<vmem>>, vector<1x12x28xf32>
    %99 = vector.shape_cast %98 : vector<1x12x28xf32> to vector<12x28xf32>
    %c0_26 = arith.constant 0 : index
    %c0_27 = arith.constant 0 : index
    %100 = vector.load %arg5[%c0_26, %c0_27] : memref<28x352xf32, #tpu.memory_space<vmem>>, vector<28x256xf32>
    %cst_28 = arith.constant dense<0.000000e+00> : vector<12x256xf32>
    %101 = tpu.matmul %99, %100, %cst_28 {dimension_numbers = #tpu.dot_dimension_numbers<[1], [0], [0], [1], [0, 0, 1, 1], [], []>} : vector<12x28xf32>, vector<28x256xf32>, vector<12x256xf32> -> vector<12x256xf32>
    %c1 = arith.constant 1 : index
    %c0_29 = arith.constant 0 : index
    %c0_30 = arith.constant 0 : index
    %102 = vector.load %arg2[%c1, %c0_29, %c0_30] : memref<7x12x28xf32, #tpu.memory_space<vmem>>, vector<1x12x28xf32>
    %103 = vector.shape_cast %102 : vector<1x12x28xf32> to vector<12x28xf32>
    %c0_31 = arith.constant 0 : index
    %c16_32 = arith.constant 16 : index
    %104 = vector.load %arg5[%c0_31, %c16_32] : memref<28x352xf32, #tpu.memory_space<vmem>>, vector<28x256xf32>
    %cst_33 = arith.constant dense<0.000000e+00> : vector<12x256xf32>
    %105 = tpu.matmul %103, %104, %cst_33 {dimension_numbers = #tpu.dot_dimension_numbers<[1], [0], [0], [1], [0, 0, 1, 1], [], []>} : vector<12x28xf32>, vector<28x256xf32>, vector<12x256xf32> -> vector<12x256xf32>
    %106 = arith.addf %101, %105 : vector<12x256xf32>
    %c2 = arith.constant 2 : index
    %c0_34 = arith.constant 0 : index
    %c0_35 = arith.constant 0 : index
    %107 = vector.load %arg2[%c2, %c0_34, %c0_35] : memref<7x12x28xf32, #tpu.memory_space<vmem>>, vector<1x12x28xf32>
    %108 = vector.shape_cast %107 : vector<1x12x28xf32> to vector<12x28xf32>
    %c0_36 = arith.constant 0 : index
    %c32 = arith.constant 32 : index
    %109 = vector.load %arg5[%c0_36, %c32] : memref<28x352xf32, #tpu.memory_space<vmem>>, vector<28x256xf32>
    %cst_37 = arith.constant dense<0.000000e+00> : vector<12x256xf32>
    %110 = tpu.matmul %108, %109, %cst_37 {dimension_numbers = #tpu.dot_dimension_numbers<[1], [0], [0], [1], [0, 0, 1, 1], [], []>} : vector<12x28xf32>, vector<28x256xf32>, vector<12x256xf32> -> vector<12x256xf32>
    %111 = arith.addf %106, %110 : vector<12x256xf32>
    %c3 = arith.constant 3 : index
    %c0_38 = arith.constant 0 : index
    %c0_39 = arith.constant 0 : index
    %112 = vector.load %arg2[%c3, %c0_38, %c0_39] : memref<7x12x28xf32, #tpu.memory_space<vmem>>, vector<1x12x28xf32>
    %113 = vector.shape_cast %112 : vector<1x12x28xf32> to vector<12x28xf32>
    %c0_40 = arith.constant 0 : index
    %c48 = arith.constant 48 : index
    %114 = vector.load %arg5[%c0_40, %c48] : memref<28x352xf32, #tpu.memory_space<vmem>>, vector<28x256xf32>
    %cst_41 = arith.constant dense<0.000000e+00> : vector<12x256xf32>
    %115 = tpu.matmul %113, %114, %cst_41 {dimension_numbers = #tpu.dot_dimension_numbers<[1], [0], [0], [1], [0, 0, 1, 1], [], []>} : vector<12x28xf32>, vector<28x256xf32>, vector<12x256xf32> -> vector<12x256xf32>
    %116 = arith.addf %111, %115 : vector<12x256xf32>
    %c4_42 = arith.constant 4 : index
    %c0_43 = arith.constant 0 : index
    %c0_44 = arith.constant 0 : index
    %117 = vector.load %arg2[%c4_42, %c0_43, %c0_44] : memref<7x12x28xf32, #tpu.memory_space<vmem>>, vector<1x12x28xf32>
    %118 = vector.shape_cast %117 : vector<1x12x28xf32> to vector<12x28xf32>
    %c0_45 = arith.constant 0 : index
    %c64 = arith.constant 64 : index
    %119 = vector.load %arg5[%c0_45, %c64] : memref<28x352xf32, #tpu.memory_space<vmem>>, vector<28x256xf32>
    %cst_46 = arith.constant dense<0.000000e+00> : vector<12x256xf32>
    %120 = tpu.matmul %118, %119, %cst_46 {dimension_numbers = #tpu.dot_dimension_numbers<[1], [0], [0], [1], [0, 0, 1, 1], [], []>} : vector<12x28xf32>, vector<28x256xf32>, vector<12x256xf32> -> vector<12x256xf32>
    %121 = arith.addf %116, %120 : vector<12x256xf32>
    %c5 = arith.constant 5 : index
    %c0_47 = arith.constant 0 : index
    %c0_48 = arith.constant 0 : index
    %122 = vector.load %arg2[%c5, %c0_47, %c0_48] : memref<7x12x28xf32, #tpu.memory_space<vmem>>, vector<1x12x28xf32>
    %123 = vector.shape_cast %122 : vector<1x12x28xf32> to vector<12x28xf32>
    %c0_49 = arith.constant 0 : index
    %c80 = arith.constant 80 : index
    %124 = vector.load %arg5[%c0_49, %c80] : memref<28x352xf32, #tpu.memory_space<vmem>>, vector<28x256xf32>
    %cst_50 = arith.constant dense<0.000000e+00> : vector<12x256xf32>
    %125 = tpu.matmul %123, %124, %cst_50 {dimension_numbers = #tpu.dot_dimension_numbers<[1], [0], [0], [1], [0, 0, 1, 1], [], []>} : vector<12x28xf32>, vector<28x256xf32>, vector<12x256xf32> -> vector<12x256xf32>
    %126 = arith.addf %121, %125 : vector<12x256xf32>
    %c6 = arith.constant 6 : index
    %c0_51 = arith.constant 0 : index
    %c0_52 = arith.constant 0 : index
    %127 = vector.load %arg2[%c6, %c0_51, %c0_52] : memref<7x12x28xf32, #tpu.memory_space<vmem>>, vector<1x12x28xf32>
    %128 = vector.shape_cast %127 : vector<1x12x28xf32> to vector<12x28xf32>
    %c0_53 = arith.constant 0 : index
    %c96 = arith.constant 96 : index
    %129 = vector.load %arg5[%c0_53, %c96] : memref<28x352xf32, #tpu.memory_space<vmem>>, vector<28x256xf32>
    %cst_54 = arith.constant dense<0.000000e+00> : vector<12x256xf32>
    %130 = tpu.matmul %128, %129, %cst_54 {dimension_numbers = #tpu.dot_dimension_numbers<[1], [0], [0], [1], [0, 0, 1, 1], [], []>} : vector<12x28xf32>, vector<28x256xf32>, vector<12x256xf32> -> vector<12x256xf32>
    %131 = arith.addf %126, %130 : vector<12x256xf32>
    %132 = vector.shape_cast %131 : vector<12x256xf32> to vector<1x12x256xf32>
    %c0_55 = arith.constant 0 : index
    %c0_56 = arith.constant 0 : index
    %c0_57 = arith.constant 0 : index
    %133 = vector.load %arg3[%c0_55, %c0_56, %c0_57] : memref<1x12x256xf32, #tpu.memory_space<vmem>>, vector<1x12x256xf32>
    tpu.vector_store %arg3[%c0_55, %c0_56, %c0_57], %132 {strides = array<i32>} : memref<1x12x256xf32, #tpu.memory_space<vmem>>, vector<1x12x256xf32>,
    %cst_58 = arith.constant dense<0.000000e+00> : vector<12xf32>
    %134 = vector.multi_reduction <add>, %131, %cst_58 [1] : vector<12x256xf32> to vector<12xf32>
    %135 = vector.shape_cast %134 : vector<12xf32> to vector<12x1xf32>
    %cst_59 = arith.constant 3.906250e-03 : f32
    %136 = vector.broadcast %cst_59 : f32 to vector<12x1xf32>
    %137 = arith.mulf %135, %136 : vector<12x1xf32>
    %138 = vector.broadcast %137 : vector<12x1xf32> to vector<12x256xf32>
    %139 = arith.subf %131, %138 : vector<12x256xf32>
    %140 = arith.mulf %139, %139 : vector<12x256xf32>
    %cst_60 = arith.constant dense<0.000000e+00> : vector<12xf32>
    %141 = vector.multi_reduction <add>, %140, %cst_60 [1] : vector<12x256xf32> to vector<12xf32>
    %142 = vector.shape_cast %141 : vector<12xf32> to vector<12x1xf32>
    %143 = tpu.concatenate %135, %142 in 1 : vector<12x1xf32>, vector<12x1xf32> -> vector<12x2xf32>
    %144 = vector.shape_cast %143 : vector<12x2xf32> to vector<1x12x2xf32>
    %c0_61 = arith.constant 0 : index
    %c0_62 = arith.constant 0 : index
    %c0_63 = arith.constant 0 : index
    %145 = vector.load %arg4[%c0_61, %c0_62, %c0_63] : memref<1x12x2xf32, #tpu.memory_space<vmem>>, vector<1x12x2xf32>
    tpu.vector_store %arg4[%c0_61, %c0_62, %c0_63], %144 {strides = array<i32>} : memref<1x12x2xf32, #tpu.memory_space<vmem>>, vector<1x12x2xf32>,
    return
  }
  func.func @transform_0(%arg0: i32) -> (i32, i32, i32) {
    %c0_i32 = arith.constant 0 : i32
    %c0_i32_0 = arith.constant 0 : i32
    %c0_i32_1 = arith.constant 0 : i32
    return %arg0, %c0_i32, %c0_i32_0 : i32, i32, i32
  }
  func.func @transform_1(%arg0: i32) -> (i32, i32, i32) {
    %c0_i32 = arith.constant 0 : i32
    %c0_i32_0 = arith.constant 0 : i32
    %c0_i32_1 = arith.constant 0 : i32
    %c0_i32_2 = arith.constant 0 : i32
    return %c0_i32, %c0_i32_0, %c0_i32_1 : i32, i32, i32
  }
  func.func @transform_2(%arg0: i32) -> (i32, i32, i32) {
    %c0_i32 = arith.constant 0 : i32
    %c0_i32_0 = arith.constant 0 : i32
    %c0_i32_1 = arith.constant 0 : i32
    return %arg0, %c0_i32, %c0_i32_0 : i32, i32, i32
  }
  func.func @transform_3(%arg0: i32) -> (i32, i32, i32) {
    %c0_i32 = arith.constant 0 : i32
    %c0_i32_0 = arith.constant 0 : i32
    %c0_i32_1 = arith.constant 0 : i32
    return %arg0, %c0_i32, %c0_i32_0 : i32, i32, i32
  }
}

</mosaic_0001>

<bundles_post_ra>
// kernel: tpu_custom_call.1
= control target key start
LH: loop header
LB: loop body
LE: loop exit
PB: predicated region body
PF: predicated region fallthrough
CT: control target
= control target key end

     0   :  { %s1651_s12 = smov 0   ;;  %s2082_s0 = inlined_call_operand.vmem [shape: f32[2,4,256], index: 0, kind: input, shape index: {}]   ;;  %s2083_s1 = inlined_call_operand.vmem [shape: f32[7,12,28], index: 1, kind: input, shape index: {}]   ;;  %s2084_s2 = inlined_call_operand.vmem [shape: f32[2,12,256], index: 2, kind: output, shape index: {0}]   ;;  %s2085_s3 = inlined_call_operand.vmem [shape: f32[2,12,2], index: 3, kind: output, shape index: {1}]  }
   0x1 LB: > { %s1522_s13 = sadd.s32 4294967295, %s1615_s12   ;;  %p1526_p0 = scmp.ge.s32.totalorder %s1615_s12, 1  ;;  %s1615_s12 = sphi %s1651_s12, %s14_s12  }
   0x2   : > { %p140_p1 = scmp.lt.s32.totalorder %s1615_s12, 3 }
   0x4   : > { %p141_p2 = pnand %p1526_p0, %p140_p1 }
   0x5   : > { %p169_p3 = scmp.lt.s32.totalorder (!%p141_p2), %s1522_s13, 1  ;;  %s1617_s18 = smov (!%p141_p2), 51  }
   0x6   : > { %144 = sbr.rel (%p141_p2) target bundleno = 1023 (0x3ff), region = 28  ;;  %s1618_s19 = smov (!%p141_p2), 122  }
   0x7   : > { %s1619_s20 = smov (!%p141_p2), 123   ;;  %s1620_s21 = smov (!%p141_p2), 125  }
   0x8   : > { %s1621_s22 = smov (!%p141_p2), 124   ;;  %s1622_s23 = smov (!%p141_p2), 126  }
   0x9   : > { %s1623_s24 = smov (!%p141_p2), 127   ;;  %s1624_s25 = smov (!%p141_p2), 112  }
   0xa   : > { %s1625_s26 = smov (!%p141_p2), 96   ;;  %s1626_s27 = smov (!%p141_p2), 80  }
   0xb   : > { %s2087_s13 = smov (!%p169_p3, %s1522_s13), 1  ;;  %v198_v2 = vlaneseq  ;;  %vm191_vm0 = vcmask 416768   ;;  %vm258_vm4 = vcmask 781312   ;;  %vm434_vm5 = vcmask 1006592   ;;  %s1627_s28 = smov 64  }
   0xc   : > { %s1575_s14 = sshll.u32 %s2087_s13, 3  ;;  %vm476_vm6 = vcmask 998400   ;;  %vm401_vm10 = vcmask 1014784   ;;  %vm303_vm13 = vcmask 785412   ;;  %vm359_vm15 = vcmask 1022976   ;;  %s1629_s29 = smov 48  }
   0xd   : > { %s173_s17 = scalar_lea.vmem %s2082_s0, %s1575_s14  ;;  %v199_v3 = vand.u32 127, %v198_v2  ;;  %s1630_s5 = smov 32  }
   0xe   : > { %v184_v0 = vld [vmem:[%s173_s17] sm:$0xff]  ;;  %s1576_s7 = sshll.u32 %s2087_s13, 5  ;;  %s1577_s11 = sshll.u32 %s2087_s13, 4 }
   0xf   : > { %187 = vrot.lane.b32.xlu0 %v184_v0, %s1617_s18  ;;  %v186_v1 = vcombine.high %v184_v0, %v184_v0  ;;  %v1665_v4 = vand.u32 15, %v199_v3  ;;  %v200_v5 = vadd.s32 128, %v199_v3  ;;  %v201_v6 = vadd.s32 256, %v199_v3  ;;  %s178_s10 = scalar_lea.vmem %s2084_s2, %s1576_s7  ;;  %s183_s16 = scalar_lea.vmem %s2085_s3, %s1577_s11 }
  0x11   : > { %vm238_vm1 = vcmp.ge.s32.totalorder %v1665_v4, 3  ;;  %v1668_v7 = vand.u32 15, %v200_v5  ;;  %v1670_v8 = vand.u32 15, %v201_v6  ;;  %vm416_vm7 = vcmp.lt.s32.totalorder %v1665_v4, 14 }
  0x12   : > { %vm458_vm8 = vcmp.lt.s32.totalorder %v1665_v4, 13  ;;  %vm383_vm12 = vcmp.lt.s32.totalorder %v1665_v4, 15 }
  0x13   : > { %189 = vrot.lane.b32.xlu0 %v186_v1, %s1617_s18  ;;  %vm239_vm2 = vcmp.ge.s32.totalorder %v1668_v7, 3  ;;  %vm240_vm3 = vcmp.ge.s32.totalorder %v1670_v8, 3  ;;  %vm418_vm9 = vcmp.lt.s32.totalorder %v1670_v8, 14  ;;  %vm417_vm11 = vcmp.lt.s32.totalorder %v1668_v7, 14 }
  0x14   : > { %vm460_vm14 = vcmp.lt.s32.totalorder %v1670_v8, 13 }
  0x81   : > { %v188_v9 = vpop.permute.xlu0 %187 }
  0x82   : > { %v196_v10 = vsel %vm191_vm0, 0.0, %v188_v9 }
  0x83   : > { %v253_v11 = vsel %vm238_vm1, %v196_v10, 0.0  ;;  %470 = vrot.lane.b32.xlu1 %v196_v10, %s1618_s19  ;;  %428 = vrot.lane.b32.xlu0 %v196_v10, %s1619_s20  ;;  %vm385_vm1 = vcmp.lt.s32.totalorder %v1670_v8, 15 }
  0x84   : > { %256 = vst [vmem:[#allocation2] sm:$0xf] %v253_v11 }
  0x85   : > { %v190_v12 = vpop.permute.xlu0 %189 }
  0x86   : > { %v192_v13 = vsel %vm191_vm0, %v188_v9, %v190_v12  ;;  %v197_v14 = vsel %vm191_vm0, %v190_v12, 0.0  ;;  %vm459_vm0 = vcmp.lt.s32.totalorder %v1668_v7, 13 }
  0x87   : > { %v254_v15 = vsel %vm239_vm2, %v192_v13, 0.0  ;;  %353 = vrot.lane.b32.xlu1 %v196_v10, %s1620_s21  ;;  %395 = vrot.lane.b32.xlu0 %v196_v10, %s1621_s22  ;;  %v255_v16 = vsel %vm240_vm3, %v197_v14, 0.0  ;;  %vm262_vm2 = vcmp.ge.s32.totalorder %v1670_v8, 2  ;;  %vm384_vm3 = vcmp.lt.s32.totalorder %v1668_v7, 15 }
  0x88   : > { %257 = vst [vmem:[#allocation2 + $0x8] sm:$0xf] %v254_v15  ;;  %259 = vst.msk [vmem:[#allocation2 + $0x10] sm:$0xf] %vm258_vm4, %v255_v16  ;;  %v488_v16 = vld [vmem:[%s2083_s1] sm:$0xff] }
  0x8b   : > { %320 = vrot.lane.b32.xlu1 %v196_v10, %s1622_s23  ;;  %277 = vrot.lane.b32.xlu0 %v196_v10, %s1623_s24 }
  0x8f   : > { %472 = vrot.lane.b32.xlu0 %v192_v13, %s1618_s19  ;;  %430 = vrot.lane.b32.xlu1 %v192_v13, %s1619_s20 }
  0x93   : > { %397 = vrot.lane.b32.xlu0 %v192_v13, %s1621_s22  ;;  %432 = vrot.lane.b32.xlu1 %v197_v14, %s1619_s20 }
  0x97   : > { %355 = vrot.lane.b32.xlu0 %v192_v13, %s1620_s21  ;;  %474 = vrot.lane.b32.xlu1 %v197_v14, %s1618_s19 }
  0x9b   : > { %281 = vrot.lane.b32.xlu0 %v197_v14, %s1623_s24  ;;  %399 = vrot.lane.b32.xlu1 %v197_v14, %s1621_s22 }
  0x9f   : > { %324 = vrot.lane.b32.xlu0 %v197_v14, %s1622_s23  ;;  %357 = vrot.lane.b32.xlu1 %v197_v14, %s1620_s21 }
  0xa3   : > { %279 = vrot.lane.b32.xlu1 %v192_v13, %s1623_s24 }
  0xa7   : > { %322 = vrot.lane.b32.xlu1 %v192_v13, %s1622_s23 }
  0xf5   : > { %v471_v17 = vpop.permute.xlu1 %470  ;;  %v429_v18 = vpop.permute.xlu0 %428 }
  0xf9   : > { %v354_v19 = vpop.permute.xlu1 %353  ;;  %v396_v20 = vpop.permute.xlu0 %395 }
  0xfd   : > { %v1678_v21 = vpop.permute.xlu1 %320  ;;  %v1680_v22 = vpop.permute.xlu0 %277 }
 0x101   : > { %v431_v23 = vpop.permute.xlu1 %430  ;;  %v473_v24 = vpop.permute.xlu0 %472 }
 0x102   : > { %v435_v25 = vsel %vm434_vm5, %v429_v18, %v431_v23  ;;  %v477_v26 = vsel %vm476_vm6, %v471_v17, %v473_v24 }
 0x103   : > { %v440_v27 = vsel %vm416_vm7, %v435_v25, 0.0  ;;  %v482_v28 = vsel %vm458_vm8, %v477_v26, 0.0  ;;  %vm283_vm7 = vcmask 1039360   ;;  %vm260_vm8 = vcmp.ge.s32.totalorder %v1665_v4, 2 }
 0x104   : > { %v446_v29 = vrot.slane %v440_v27, 4  ;;  %485 = vst [vmem:[#allocation2 + $0x48] sm:$0xf] %v482_v28 }
 0x105   : > { %v433_v30 = vpop.permute.xlu1 %432  ;;  %v398_v31 = vpop.permute.xlu0 %397 }
 0x106   : > { %452 = vst [vmem:[#allocation2 + $0x30] sm:$0xf0] %v446_v29  ;;  %v436_v32 = vsel %vm434_vm5, %v431_v23, %v433_v30  ;;  %v442_v33 = vsel %vm418_vm9, %v433_v30, 0.0  ;;  %v402_v34 = vsel %vm401_vm10, %v396_v20, %v398_v31  ;;  %vm307_vm5 = vcmp.ge.s32.totalorder %v1670_v8, 1 }
 0x107   : > { %v441_v35 = vsel %vm417_vm11, %v436_v32, 0.0  ;;  %v448_v36 = vrot.slane %v442_v33, 4  ;;  %v407_v37 = vsel %vm383_vm12, %v402_v34, 0.0  ;;  %vm261_vm9 = vcmp.ge.s32.totalorder %v1668_v7, 2 }
 0x108   : > { %v447_v38 = vrot.slane %v441_v35, 4  ;;  %410 = vst [vmem:[#allocation2 + $0x30] sm:$0xf] %v407_v37  ;;  %vm306_vm11 = vcmp.ge.s32.totalorder %v1668_v7, 1  ;;  %vm556_vm12 = vcmask 228352  }
 0x109   : > { %454 = vst.msk [vmem:[#allocation2 + $0x40] sm:$0xf0] %vm303_vm13, %v448_v36  ;;  %v475_v39 = vpop.permute.xlu1 %474  ;;  %v356_v40 = vpop.permute.xlu0 %355 }
 0x10a   : > { %453 = vst [vmem:[#allocation2 + $0x38] sm:$0xf0] %v447_v38  ;;  %v478_v41 = vsel %vm476_vm6, %v473_v24, %v475_v39  ;;  %v484_v42 = vsel %vm460_vm14, %v475_v39, 0.0  ;;  %v360_v43 = vsel %vm359_vm15, %v354_v19, %v356_v40  ;;  %vm563_vm6 = vcmask 1043456  }
 0x10b   : > { %v483_v44 = vsel %vm459_vm0, %v478_v41, 0.0  ;;  %487 = vst.msk [vmem:[#allocation2 + $0x58] sm:$0xf] %vm258_vm4, %v484_v42  ;;  %v371_v45 = vrot.slane %v360_v43, 4  ;;  %v1716_v61 = vld [vmem:[#allocation2 + $0x48] sm:$0xf] }
 0x10c   : > { %486 = vst [vmem:[#allocation2 + $0x50] sm:$0xf] %v483_v44  ;;  %vm759_vm14 = vcmask 785408   ;;  %vm1025_vm0 = vcmask 523264  }
 0x10d   : > { %377 = vst [vmem:[#allocation2 + $0x18] sm:$0xf0] %v371_v45  ;;  %v400_v46 = vpop.permute.xlu1 %399  ;;  %v282_v47 = vpop.permute.xlu0 %281 }
 0x10e   : > { %v403_v48 = vsel %vm401_vm10, %v398_v31, %v400_v46  ;;  %v409_v49 = vsel %vm385_vm1, %v400_v46, 0.0  ;;  %v291_v50 = vsel %vm262_vm2, %v282_v47, 0.0  ;;  %vm305_vm10 = vcmp.ge.s32.totalorder %v1665_v4, 1 }
 0x10f   : > { %v408_v51 = vsel %vm384_vm3, %v403_v48, 0.0  ;;  %412 = vst.msk [vmem:[#allocation2 + $0x40] sm:$0xf] %vm258_vm4, %v409_v49  ;;  %v297_v52 = vrot.slane %v291_v50, 4  ;;  %v1729_v8 = vld [vmem:[#allocation2 + $0x30] sm:$0xff]  ;;  %v1628_v4 = vmov 0.0  }
 0x110   : > { %411 = vst [vmem:[#allocation2 + $0x38] sm:$0xf] %v408_v51  ;;  %719 = vmatprep.mubr.f32.mxu1 %v1628_v4  ;;  %632 = vmatprep.mubr.f32.mxu0 %v1628_v4  ;;  %vm1158_vm1 = vcmask 392192   ;;  %vm1291_vm2 = vcmask 261120   ;;  %vm1427_vm3 = vcmask 7168  }
 0x111   : > { %304 = vst.msk [vmem:[#allocation2 + $0x10] sm:$0xf0] %vm303_vm13, %v297_v52  ;;  %v358_v53 = vpop.permute.xlu1 %357  ;;  %v325_v54 = vpop.permute.xlu0 %324 }
 0x112   : > { %v361_v55 = vsel %vm359_vm15, %v356_v40, %v358_v53  ;;  %v373_v56 = vrot.slane %v358_v53, 4  ;;  %v334_v57 = vsel %vm307_vm5, %v325_v54, 0.0  ;;  %v504_v58 = vld [vmem:[#allocation2 + $0x58] sm:$0xf]  ;;  %vm892_vm15 = vcmask 654336  }
 0x113   : > { %v372_v59 = vrot.slane %v361_v55, 4  ;;  %337 = vst.msk [vmem:[#allocation2 + $0x28] sm:$0xf] %vm258_vm4, %v334_v57  ;;  %539 = vrot.lane.b32.xlu1 %v504_v58, %s1624_s25  ;;  %v1707_v60 = vld [vmem:[#allocation2 + $0x50] sm:$0xf]  ;;  %vm326_vm4 = vcmask 1031168  }
 0x114   : > { %379 = vst.msk [vmem:[#allocation2 + $0x28] sm:$0xf0] %vm303_vm13, %v373_v56  ;;  %537 = vrot.lane.b32.xlu0 %v1707_v60, %s1624_s25  ;;  %1539 = vmatprep.subr.msk.mxu1 %vm563_vm6, %v1707_v60  ;;  %vm541_vm13 = vcmask 916480   ;;  %vm1430_vm5 = vcmask 15360  }
 0x115   : > { %378 = vst [vmem:[#allocation2 + $0x20] sm:$0xf0] %v372_v59  ;;  %v280_v62 = vpop.permute.xlu1 %279  ;;  %1540 = vmatpush1.msk.msra.mxu1 %vm563_vm6, %v1716_v61 }
 0x116   : > { %v284_v63 = vsel %vm283_vm7, %v1680_v22, %v280_v62  ;;  %v285_v0 = vsel %vm283_vm7, %v280_v62, %v282_v47  ;;  %v503_v19 = vld [vmem:[#allocation2 + $0x40] sm:$0xff]  ;;  %vm1432_vm7 = vcmask 11264  }
 0x117   : > { %v289_v1 = vsel %vm260_vm8, %v284_v63, 0.0  ;;  %v290_v2 = vsel %vm261_vm9, %v285_v0, 0.0  ;;  %757 = vrot.lane.b32.xlu1 %v504_v58, %s1625_s26  ;;  %v1722_v3 = vld [vmem:[#allocation2 + $0x38] sm:$0xff] }
 0x118   : > { %v295_v5 = vrot.slane %v289_v1, 4  ;;  %v296_v6 = vrot.slane %v290_v2, 4  ;;  %535 = vrot.lane.b32.xlu0 %v1716_v61, %s1624_s25  ;;  %681 = vmatprep.subr.mxu1 %v1722_v3  ;;  %v1783_v20 = vld [vmem:[#allocation2 + $0x10] sm:$0xff] }
 0x119   : > { %v323_v9 = vpop.permute.xlu1 %322  ;;  %682 = vmatpush1.msra.mxu1 %v1729_v8 }
 0x11a   : > { %301 = vst [vmem:[#allocation2] sm:$0xf0] %v295_v5  ;;  %302 = vst [vmem:[#allocation2 + $0x8] sm:$0xf0] %v296_v6  ;;  %v327_v10 = vsel %vm326_vm4, %v1678_v21, %v323_v9  ;;  %v328_v11 = vsel %vm326_vm4, %v323_v9, %v325_v54  ;;  %v489_v21 = vld [vmem:[%s2083_s1 + $0x8] sm:$0xf] }
 0x11b   : > { %v332_v12 = vsel %vm305_vm10, %v327_v10, 0.0  ;;  %v333_v13 = vsel %vm306_vm11, %v328_v11, 0.0  ;;  %890 = vrot.lane.b32.xlu1 %v504_v58, %s1626_s27  ;;  %v502_v18 = vld [vmem:[#allocation2 + $0x28] sm:$0xff] }
 0x11c   : > { %335 = vst [vmem:[#allocation2 + $0x18] sm:$0xf] %v332_v12  ;;  %336 = vst [vmem:[#allocation2 + $0x20] sm:$0xf] %v333_v13  ;;  %755 = vrot.lane.b32.xlu0 %v1707_v60, %s1625_s26 }
 0x11f   : > { %1023 = vrot.lane.b32.xlu1 %v504_v58, %s1627_s28 }
 0x120   : > { %888 = vrot.lane.b32.xlu0 %v1707_v60, %s1626_s27 }
 0x121   : > { %v1747_v15 = vld [vmem:[#allocation2 + $0x8] sm:$0xff]  ;;  %v1753_v17 = vld [vmem:[#allocation2] sm:$0xff] }
 0x123   : > { %1156 = vrot.lane.b32.xlu1 %v504_v58, %s1629_s29  ;;  %v493_v7 = vld [vmem:[#allocation2 + $0x20] sm:$0xff]  ;;  %v1742_v14 = vld [vmem:[#allocation2 + $0x18] sm:$0xff] }
 0x124   : > { %753 = vrot.lane.b32.xlu0 %v1716_v61, %s1625_s26  ;;  %683 = vmatprep.subr.mxu1 %v493_v7 }
 0x125   : > { %684 = vmatpush1.msra.mxu1 %v1742_v14 }
 0x126   : > { %685 = vmatprep.subr.mxu1 %v1747_v15 }
 0x127   : > { %1289 = vrot.lane.b32.xlu1 %v504_v58, %s1630_s5  ;;  %686 = vmatpush1.msra.mxu1 %v1753_v17 }
 0x128   : > { %1021 = vrot.lane.b32.xlu0 %v1707_v60, %s1627_s28  ;;  %1541 = vmatmul.mubr.msk.f32.vlgmr.msra.gmra.mxu1 %vm556_vm12, %v488_v16 }
 0x129   : > { %725 = vmatprep.mubr.f32.mxu1 %v1628_v4 }
 0x12b   : > { %527 = vrot.lane.b32.xlu1 %v502_v18, %s1624_s25 }
 0x12c   : > { %1154 = vrot.lane.b32.xlu0 %v1707_v60, %s1629_s29  ;;  %1542 = vmatmul.mubr.msk.f32.gmra.mxu1 %vm556_vm12, %v489_v21 }
 0x12d   : > { %981 = vmatprep.mubr.f32.mxu1 %v1628_v4 }
 0x12f   : > { %886 = vrot.lane.b32.xlu1 %v1716_v61, %s1626_s27 }
 0x130   : > { %1019 = vrot.lane.b32.xlu0 %v1716_v61, %s1627_s28 }
 0x133   : > { %745 = vrot.lane.b32.xlu1 %v502_v18, %s1625_s26 }
 0x134   : > { %1287 = vrot.lane.b32.xlu0 %v1707_v60, %s1630_s5 }
 0x137   : > { %878 = vrot.lane.b32.xlu1 %v502_v18, %s1626_s27 }
 0x138   : > { %1285 = vrot.lane.b32.xlu0 %v1716_v61, %s1630_s5 }
 0x13b   : > { %1152 = vrot.lane.b32.xlu1 %v1716_v61, %s1629_s29 }
 0x13c   : > { %533 = vrot.lane.b32.xlu0 %v503_v19, %s1624_s25 }
 0x13f   : > { %1011 = vrot.lane.b32.xlu1 %v502_v18, %s1627_s28 }
 0x140   : > { %525 = vrot.lane.b32.xlu0 %v493_v7, %s1624_s25 }
 0x143   : > { %1144 = vrot.lane.b32.xlu1 %v502_v18, %s1629_s29 }
 0x144   : > { %523 = vrot.lane.b32.xlu0 %v1742_v14, %s1624_s25 }
 0x147   : > { %1277 = vrot.lane.b32.xlu1 %v502_v18, %s1630_s5 }
 0x148   : > { %521 = vrot.lane.b32.xlu0 %v1783_v20, %s1624_s25 }
 0x14b   : > { %751 = vrot.lane.b32.xlu1 %v503_v19, %s1625_s26 }
 0x14c   : > { %743 = vrot.lane.b32.xlu0 %v493_v7, %s1625_s26 }
 0x14f   : > { %884 = vrot.lane.b32.xlu1 %v503_v19, %s1626_s27 }
 0x150   : > { %876 = vrot.lane.b32.xlu0 %v493_v7, %s1626_s27 }
 0x153   : > { %874 = vrot.lane.b32.xlu1 %v1742_v14, %s1626_s27 }
 0x154   : > { %741 = vrot.lane.b32.xlu0 %v1742_v14, %s1625_s26 }
 0x157   : > { %739 = vrot.lane.b32.xlu1 %v1783_v20, %s1625_s26 }
 0x158   : > { %1009 = vrot.lane.b32.xlu0 %v493_v7, %s1627_s28 }
 0x15b   : > { %872 = vrot.lane.b32.xlu1 %v1783_v20, %s1626_s27 }
 0x15c   : > { %1142 = vrot.lane.b32.xlu0 %v493_v7, %s1629_s29 }
 0x15f   : > { %1017 = vrot.lane.b32.xlu1 %v503_v19, %s1627_s28 }
 0x160   : > { %1007 = vrot.lane.b32.xlu0 %v1742_v14, %s1627_s28 }
 0x163   : > { %1150 = vrot.lane.b32.xlu1 %v503_v19, %s1629_s29 }
 0x164   : > { %1283 = vrot.lane.b32.xlu0 %v503_v19, %s1630_s5 }
 0x167   : > { %1140 = vrot.lane.b32.xlu1 %v1742_v14, %s1629_s29 }
 0x168   : > { %1275 = vrot.lane.b32.xlu0 %v493_v7, %s1630_s5 }
 0x16b   : > { %1005 = vrot.lane.b32.xlu1 %v1783_v20, %s1627_s28 }
 0x16c   : > { %749 = vrot.lane.b32.xlu0 %v1722_v3, %s1625_s26 }
 0x16f   : > { %1138 = vrot.lane.b32.xlu1 %v1783_v20, %s1629_s29 }
 0x170   : > { %882 = vrot.lane.b32.xlu0 %v1722_v3, %s1626_s27 }
 0x173   : > { %531 = vrot.lane.b32.xlu1 %v1722_v3, %s1624_s25 }
 0x174   : > { %747 = vrot.lane.b32.xlu0 %v1729_v8, %s1625_s26 }
 0x177   : > { %529 = vrot.lane.b32.xlu1 %v1729_v8, %s1624_s25 }
 0x178   : > { %737 = vrot.lane.b32.xlu0 %v1747_v15, %s1625_s26 }
 0x17b   : > { %519 = vrot.lane.b32.xlu1 %v1747_v15, %s1624_s25 }
 0x17c   : > { %870 = vrot.lane.b32.xlu0 %v1747_v15, %s1626_s27 }
 0x17f   : > { %517 = vrot.lane.b32.xlu1 %v1753_v17, %s1624_s25 }
 0x180   : > { %735 = vrot.lane.b32.xlu0 %v1753_v17, %s1625_s26 }
 0x183   : > { %880 = vrot.lane.b32.xlu1 %v1729_v8, %s1626_s27 }
 0x184   : > { %1015 = vrot.lane.b32.xlu0 %v1722_v3, %s1627_s28 }
 0x185   : > { %v540_v22 = vpop.permute.xlu1 %539 }
 0x186   : > { %v538_v23 = vpop.permute.xlu0 %537 }
 0x187   : > { %868 = vrot.lane.b32.xlu1 %v1753_v17, %s1626_s27  ;;  %v549_v24 = vsel %vm541_vm13, %v538_v23, %v540_v22 }
 0x188   : > { %1148 = vrot.lane.b32.xlu0 %v1722_v3, %s1629_s29  ;;  %1535 = vmatprep.subr.msk.mxu0 %vm563_vm6, %v549_v24 }
 0x189   : > { %v758_v25 = vpop.permute.xlu1 %757 }
 0x18a   : > { %v536_v26 = vpop.permute.xlu0 %535 }
 0x18b   : > { %1146 = vrot.lane.b32.xlu1 %v1729_v8, %s1629_s29  ;;  %v548_v27 = vsel %vm541_vm13, %v536_v26, %v538_v23 }
 0x18c   : > { %1013 = vrot.lane.b32.xlu0 %v1729_v8, %s1627_s28  ;;  %1536 = vmatpush1.msk.msra.mxu0 %vm563_vm6, %v548_v27 }
 0x18d   : > { %v891_v28 = vpop.permute.xlu1 %890 }
 0x18e   : > { %v756_v29 = vpop.permute.xlu0 %755 }
 0x18f   : > { %v1855_v30 = vsel %vm759_vm14, %v756_v29, %v758_v25  ;;  %1134 = vrot.lane.b32.xlu1 %v1753_v17, %s1629_s29 }
 0x190   : > { %1003 = vrot.lane.b32.xlu0 %v1747_v15, %s1627_s28 }
 0x191   : > { %v1024_v31 = vpop.permute.xlu1 %1023 }
 0x192   : > { %v889_v32 = vpop.permute.xlu0 %888 }
 0x193   : > { %v900_v33 = vsel %vm892_vm15, %v889_v32, %v891_v28  ;;  %1281 = vrot.lane.b32.xlu1 %v1722_v3, %s1630_s5 }
 0x194   : > { %1136 = vrot.lane.b32.xlu0 %v1747_v15, %s1629_s29  ;;  %1551 = vmatprep.subr.msk.mxu1 %vm563_vm6, %v900_v33  ;;  %v1533_v33 = vld [vmem:[%s2083_s1 + $0x10] sm:$0xff] }
 0x195   : > { %v1157_v34 = vpop.permute.xlu1 %1156 }
 0x196   : > { %v754_v35 = vpop.permute.xlu0 %753 }
 0x197   : > { %v1868_v36 = vsel %vm759_vm14, %v754_v35, %v756_v29  ;;  %1279 = vrot.lane.b32.xlu1 %v1729_v8, %s1630_s5 }
 0x198   : > { %1001 = vrot.lane.b32.xlu0 %v1753_v17, %s1627_s28 }
 0x199   : > { %v1290_v37 = vpop.permute.xlu1 %1289 }
 0x19a   : > { %v1022_v38 = vpop.permute.xlu0 %1021 }
 0x19b   : > { %v1875_v39 = vsel %vm1025_vm0, %v1022_v38, %v1024_v31  ;;  %1269 = vrot.lane.b32.xlu1 %v1747_v15, %s1630_s5 }
 0x19c   : > { %1273 = vrot.lane.b32.xlu0 %v1742_v14, %s1630_s5 }
 0x19d   : > { %v528_v40 = vpop.permute.xlu1 %527 }
 0x19e   : > { %v1155_v41 = vpop.permute.xlu0 %1154 }
 0x19f   : > { %v1882_v42 = vsel %vm1158_vm1, %v1155_v41, %v1157_v34  ;;  %1267 = vrot.lane.b32.xlu1 %v1753_v17, %s1630_s5 }
 0x1a0   : > { %1271 = vrot.lane.b32.xlu0 %v1783_v20, %s1630_s5 }
 0x1a1   : > { %v887_v43 = vpop.permute.xlu1 %886 }
 0x1a2   : > { %v899_v44 = vsel %vm892_vm15, %v887_v43, %v889_v32  ;;  %v1020_v45 = vpop.permute.xlu0 %1019 }
 0x1a3   : > { %v1890_v46 = vsel %vm1025_vm0, %v1020_v45, %v1022_v38  ;;  %1552 = vmatpush1.msk.msra.mxu1 %vm563_vm6, %v899_v44 }
 0x1a5   : > { %v1893_v47 = vpop.permute.xlu1 %745 }
 0x1a6   : > { %v1288_v48 = vpop.permute.xlu0 %1287 }
 0x1a7   : > { %v1896_v49 = vsel %vm1291_vm2, %v1288_v48, %v1290_v37 }
 0x1a9   : > { %v1898_v50 = vpop.permute.xlu1 %878 }
 0x1aa   : > { %v1286_v51 = vpop.permute.xlu0 %1285 }
 0x1ab   : > { %v1901_v52 = vsel %vm1291_vm2, %v1286_v51, %v1288_v48 }
 0x1ad   : > { %v1153_v53 = vpop.permute.xlu1 %1152 }
 0x1ae   : > { %v1904_v54 = vsel %vm1158_vm1, %v1153_v53, %v1155_v41  ;;  %v534_v55 = vpop.permute.xlu0 %533 }
 0x1b1   : > { %v1906_v56 = vpop.permute.xlu1 %1011 }
 0x1b2   : > { %v526_v57 = vpop.permute.xlu0 %525 }
 0x1b3   : > { %v545_v26 = vsel %vm541_vm13, %v526_v57, %v528_v40 }
 0x1b5   : > { %v1908_v58 = vpop.permute.xlu1 %1144 }
 0x1b6   : > { %v524_v59 = vpop.permute.xlu0 %523 }
 0x1b7   : > { %v544_v27 = vsel %vm541_vm13, %v524_v59, %v526_v57  ;;  %v1543_v59 = vld [vmem:[%s2083_s1 + $0x20] sm:$0xff] }
 0x1b9   : > { %v1910_v60 = vpop.permute.xlu1 %1277 }
 0x1ba   : > { %v522_v61 = vpop.permute.xlu0 %521 }
 0x1bd   : > { %v752_v62 = vpop.permute.xlu1 %751 }
 0x1be   : > { %v744_v63 = vpop.permute.xlu0 %743 }
 0x1bf   : > { %v763_v44 = vsel %vm759_vm14, %v744_v63, %v1893_v47 }
 0x1c1   : > { %v885_v0 = vpop.permute.xlu1 %884 }
 0x1c2   : > { %v877_v1 = vpop.permute.xlu0 %876 }
 0x1c5   : > { %v875_v2 = vpop.permute.xlu1 %874 }
 0x1c6   : > { %v742_v3 = vpop.permute.xlu0 %741  ;;  %v895_v45 = vsel %vm892_vm15, %v875_v2, %v877_v1 }
 0x1c7   : > { %v762_v48 = vsel %vm759_vm14, %v742_v3, %v744_v63 }
 0x1c9   : > { %v1912_v5 = vpop.permute.xlu1 %739 }
 0x1ca   : > { %v1914_v6 = vpop.permute.xlu0 %1009 }
 0x1cd   : > { %v873_v8 = vpop.permute.xlu1 %872 }
 0x1ce   : > { %v1916_v9 = vpop.permute.xlu0 %1142 }
 0x1cf   : > { %v1162_v2 = vsel %vm1158_vm1, %v1916_v9, %v1908_v58 }
 0x1d1   : > { %v1918_v10 = vpop.permute.xlu1 %1017 }
 0x1d2   : > { %v1920_v11 = vpop.permute.xlu0 %1007 }
 0x1d3   : > { %v1028_v58 = vsel %vm1025_vm0, %v1920_v11, %v1914_v6 }
 0x1d5   : > { %v1922_v12 = vpop.permute.xlu1 %1150 }
 0x1d6   : > { %v1924_v13 = vpop.permute.xlu0 %1283 }
 0x1d9   : > { %v1926_v7 = vpop.permute.xlu1 %1140 }
 0x1da   : > { %v1928_v14 = vpop.permute.xlu0 %1275  ;;  %v1161_v3 = vsel %vm1158_vm1, %v1926_v7, %v1916_v9  ;;  %v1550_v9 = vld [vmem:[%s2083_s1 + $0x38] sm:$0xf]  ;;  %v1561_v7 = vld [vmem:[%s2083_s1 + $0x50] sm:$0xff] }
 0x1dd   : > { %v1930_v15 = vpop.permute.xlu1 %1005 }
 0x1de   : > { %v750_v16 = vpop.permute.xlu0 %749 }
 0x1df   : > { %v765_v38 = vsel %vm759_vm14, %v750_v16, %v752_v62 }
 0x1e1   : > { %v1932_v17 = vpop.permute.xlu1 %1138 }
 0x1e2   : > { %v883_v18 = vpop.permute.xlu0 %882 }
 0x1e3   : > { %v898_v19 = vsel %vm892_vm15, %v883_v18, %v885_v0 }
 0x1e4   : > { %943 = vmatprep.subr.mxu1 %v898_v19 }
 0x1e5   : > { %v532_v20 = vpop.permute.xlu1 %531 }
 0x1e6   : > { %v748_v21 = vpop.permute.xlu0 %747  ;;  %v547_v22 = vsel %vm541_vm13, %v532_v20, %v534_v55 }
 0x1e7   : > { %594 = vmatprep.subr.mxu0 %v547_v22  ;;  %v764_v40 = vsel %vm759_vm14, %v748_v21, %v750_v16 }
 0x1e9   : > { %v530_v23 = vpop.permute.xlu1 %529 }
 0x1ea   : > { %v738_v24 = vpop.permute.xlu0 %737  ;;  %v546_v25 = vsel %vm541_vm13, %v530_v23, %v532_v20  ;;  %v1556_v23 = vld [vmem:[%s2083_s1 + $0x48] sm:$0xf] }
 0x1eb   : > { %595 = vmatpush1.msra.mxu0 %v546_v25  ;;  %v761_v47 = vsel %vm759_vm14, %v738_v24, %v1912_v5 }
 0x1ec   : > { %596 = vmatprep.subr.mxu0 %v545_v26 }
 0x1ed   : > { %v520_v28 = vpop.permute.xlu1 %519  ;;  %597 = vmatpush1.msra.mxu0 %v544_v27  ;;  %v1568_v27 = vld [vmem:[%s2083_s1 + $0x68] sm:$0xf] }
 0x1ee   : > { %v871_v29 = vpop.permute.xlu0 %870  ;;  %v543_v31 = vsel %vm541_vm13, %v520_v28, %v522_v61  ;;  %v1549_v61 = vld [vmem:[%s2083_s1 + $0x30] sm:$0xff] }
 0x1ef   : > { %598 = vmatprep.subr.mxu0 %v543_v31  ;;  %v894_v53 = vsel %vm892_vm15, %v871_v29, %v873_v8  ;;  %v1544_v8 = vld [vmem:[%s2083_s1 + $0x28] sm:$0xf] }
 0x1f1   : > { %v518_v32 = vpop.permute.xlu1 %517 }
 0x1f2   : > { %v736_v34 = vpop.permute.xlu0 %735  ;;  %v542_v35 = vsel %vm541_vm13, %v518_v32, %v520_v28  ;;  %v721_v28 = vpop.f32.mrf.mxu1 }
 0x1f3   : > { %599 = vmatpush1.msra.mxu0 %v542_v35  ;;  %v760_v57 = vsel %vm759_vm14, %v736_v34, %v738_v24 }
 0x1f4   : > { %1545 = vmatprep.subr.msk.mxu0 %vm563_vm6, %v1855_v30  ;;  %1537 = vmatmul.mubr.msk.f32.vlgmr.msra.gmra.mxu0 %vm556_vm12, %v1533_v33  ;;  %v1534_v30 = vld [vmem:[%s2083_s1 + $0x18] sm:$0xf] }
 0x1f5   : > { %v881_v37 = vpop.permute.xlu1 %880  ;;  %1546 = vmatpush1.msk.msra.mxu0 %vm563_vm6, %v1868_v36  ;;  %638 = vmatprep.mubr.f32.mxu0 %v1628_v4  ;;  %v896_v36 = vsel %vm892_vm15, %v877_v1, %v1898_v50 }
 0x1f6   : > { %v897_v41 = vsel %vm892_vm15, %v881_v37, %v883_v18  ;;  %810 = vmatprep.subr.mxu0 %v765_v38  ;;  %v1016_v43 = vpop.permute.xlu0 %1015  ;;  %v1555_v18 = vld [vmem:[%s2083_s1 + $0x40] sm:$0xff] }
 0x1f7   : > { %811 = vmatpush1.msra.mxu0 %v764_v40  ;;  %944 = vmatpush1.msra.mxu1 %v897_v41 }
 0x1f8   : > { %812 = vmatprep.subr.mxu0 %v763_v44  ;;  %945 = vmatprep.subr.mxu1 %v896_v36 }
 0x1f9   : > { %v869_v51 = vpop.permute.xlu1 %868  ;;  %1538 = vmatmul.mubr.msk.f32.gmra.mxu0 %vm556_vm12, %v1534_v30  ;;  %946 = vmatpush1.msra.mxu1 %v895_v45 }
 0x1fa   : > { %v893_v55 = vsel %vm892_vm15, %v869_v51, %v871_v29  ;;  %813 = vmatpush1.msra.mxu0 %v762_v48  ;;  %947 = vmatprep.subr.mxu1 %v894_v53  ;;  %v1149_v50 = vpop.permute.xlu0 %1148  ;;  %v723_v29 = vpop.f32.mrf.mxu1 }
 0x1fb   : > { %814 = vmatprep.subr.mxu0 %v761_v47  ;;  %948 = vmatpush1.msra.mxu1 %v893_v55 }
 0x1fc   : > { %815 = vmatpush1.msra.mxu0 %v760_v57  ;;  %848 = vmatprep.mubr.f32.mxu0 %v1628_v4  ;;  %v727_v33 = vpop.f32.mrf.mxu1 }
 0x1fd   : > { %1557 = vmatprep.subr.msk.mxu0 %vm563_vm6, %v1875_v39  ;;  %1563 = vmatprep.subr.msk.mxu1 %vm563_vm6, %v1882_v42  ;;  %v1147_v62 = vpop.permute.xlu1 %1146  ;;  %v1031_v39 = vsel %vm1025_vm0, %v1016_v43, %v1918_v10  ;;  %v1164_v42 = vsel %vm1158_vm1, %v1149_v50, %v1922_v12 }
 0x1fe   : > { %v1163_v63 = vsel %vm1158_vm1, %v1147_v62, %v1149_v50  ;;  %1547 = vmatmul.mubr.msk.f32.vlgmr.msra.gmra.mxu0 %vm556_vm12, %v1543_v59  ;;  %1553 = vmatmul.mubr.msk.f32.vlgmr.msra.gmra.mxu1 %vm556_vm12, %v1549_v61  ;;  %v1014_v0 = vpop.permute.xlu0 %1013  ;;  %v729_v35 = vpop.f32.mrf.mxu1 }
 0x1ff   : > { %1558 = vmatpush1.msk.msra.mxu0 %vm563_vm6, %v1890_v46  ;;  %1564 = vmatpush1.msk.msra.mxu1 %vm563_vm6, %v1904_v54  ;;  %v1030_v1 = vsel %vm1025_vm0, %v1014_v0, %v1016_v43  ;;  %v1029_v54 = vsel %vm1025_vm0, %v1914_v6, %v1906_v56 }
 0x200   : > { %1076 = vmatprep.subr.mxu0 %v1031_v39  ;;  %1209 = vmatprep.subr.mxu1 %v1164_v42 }
 0x201   : > { %1210 = vmatpush1.msra.mxu1 %v1163_v63  ;;  %1077 = vmatpush1.msra.mxu0 %v1030_v1  ;;  %v1135_v46 = vpop.permute.xlu1 %1134 }
 0x202   : > { %1211 = vmatprep.subr.mxu1 %v1162_v2  ;;  %1078 = vmatprep.subr.mxu0 %v1029_v54  ;;  %v1004_v5 = vpop.permute.xlu0 %1003 }
 0x203   : > { %1212 = vmatpush1.msra.mxu1 %v1161_v3  ;;  %854 = vmatprep.mubr.f32.mxu0 %v1628_v4  ;;  %v1027_v56 = vsel %vm1025_vm0, %v1004_v5, %v1930_v15 }
 0x204   : > { %1079 = vmatpush1.msra.mxu0 %v1028_v58  ;;  %987 = vmatprep.mubr.f32.mxu1 %v1628_v4 }
 0x205   : > { %1548 = vmatmul.mubr.msk.f32.gmra.mxu0 %vm556_vm12, %v1544_v8  ;;  %1080 = vmatprep.subr.mxu0 %v1027_v56  ;;  %v1282_v10 = vpop.permute.xlu1 %1281 }
 0x206   : > { %1554 = vmatmul.mubr.msk.f32.gmra.mxu1 %vm556_vm12, %v1550_v9  ;;  %v1137_v6 = vpop.permute.xlu0 %1136  ;;  %1114 = vmatprep.mubr.f32.mxu0 %v1628_v4  ;;  %v1297_v19 = vsel %vm1291_vm2, %v1282_v10, %v1924_v13  ;;  %v1295_v13 = vsel %vm1291_vm2, %v1928_v14, %v1910_v60 }
 0x207   : > { %v1159_v11 = vsel %vm1158_vm1, %v1135_v46, %v1137_v6  ;;  %v1160_v12 = vsel %vm1158_vm1, %v1137_v6, %v1932_v17  ;;  %1247 = vmatprep.mubr.f32.mxu1 %v1628_v4 }
 0x208   : > { %1213 = vmatprep.subr.mxu1 %v1160_v12 }
 0x209   : > { %v1280_v15 = vpop.permute.xlu1 %1279  ;;  %1214 = vmatpush1.msra.mxu1 %v1159_v11 }
 0x20a   : > { %1578 = vmatprep.subr.msk.mxu1 %vm563_vm6, %v1896_v49  ;;  %v1002_v16 = vpop.permute.xlu0 %1001  ;;  %1565 = vmatmul.mubr.msk.f32.vlgmr.msra.gmra.mxu1 %vm556_vm12, %v1561_v7  ;;  %v1296_v20 = vsel %vm1291_vm2, %v1280_v15, %v1282_v10 }
 0x20b   : > { %v1026_v17 = vsel %vm1025_vm0, %v1002_v16, %v1004_v5  ;;  %1582 = vmatpush1.msk.msra.mxu1 %vm563_vm6, %v1901_v52  ;;  %1253 = vmatprep.mubr.f32.mxu1 %v1628_v4 }
 0x20c   : > { %1081 = vmatpush1.msra.mxu0 %v1026_v17  ;;  %1579 = vmatprep.subr.mxu1 %v1297_v19 }
 0x20d   : > { %v1270_v21 = vpop.permute.xlu1 %1269  ;;  %1559 = vmatmul.mubr.msk.f32.vlgmr.msra.gmra.mxu0 %vm556_vm12, %v1555_v18  ;;  %1569 = vmatprep.subr.msk.mxu0 %vm563_vm6, %v1896_v49  ;;  %v1562_v49 = vld [vmem:[%s2083_s1 + $0x58] sm:$0xf] }
 0x20e   : > { %1583 = vmatpush1.msra.mxu1 %v1296_v20  ;;  %1570 = vmatpush1.msk.msra.mxu0 %vm563_vm6, %v1901_v52  ;;  %v1274_v22 = vpop.permute.xlu0 %1273 }
 0x20f   : > { %1580 = vmatprep.subr.mxu1 %v1295_v13  ;;  %v1294_v24 = vsel %vm1291_vm2, %v1274_v22, %v1928_v14  ;;  %1342 = vmatprep.subr.mxu0 %v1297_v19  ;;  %v1567_v14 = vld [vmem:[%s2083_s1 + $0x60] sm:$0xff] }
 0x210   : > { %1120 = vmatprep.mubr.f32.mxu0 %v1628_v4  ;;  %1343 = vmatpush1.msra.mxu0 %v1296_v20 }
 0x211   : > { %1584 = vmatpush1.msra.mxu1 %v1294_v24  ;;  %v1268_v52 = vpop.permute.xlu1 %1267  ;;  %1560 = vmatmul.mubr.msk.f32.gmra.mxu0 %vm556_vm12, %v1556_v23 }
 0x212   : > { %1344 = vmatprep.subr.mxu0 %v1295_v13  ;;  %1566 = vmatmul.mubr.msk.f32.gmra.mxu1 %vm556_vm12, %v1562_v49  ;;  %v1272_v60 = vpop.permute.xlu0 %1271  ;;  %v1292_v26 = vsel %vm1291_vm2, %v1268_v52, %v1270_v21 }
 0x213   : > { %1345 = vmatpush1.msra.mxu0 %v1294_v24  ;;  %v1293_v25 = vsel %vm1291_vm2, %v1270_v21, %v1272_v60  ;;  %1380 = vmatprep.mubr.f32.mxu0 %v1628_v4 }
 0x214   : > { %1346 = vmatprep.subr.mxu0 %v1293_v25  ;;  %1581 = vmatprep.subr.mxu1 %v1293_v25 }
 0x215   : > { %1347 = vmatpush1.msra.mxu0 %v1292_v26  ;;  %1585 = vmatpush1.msra.mxu1 %v1292_v26 }
 0x216   : > { %1386 = vmatprep.mubr.f32.mxu1 %v1628_v4  ;;  %1571 = vmatmul.mubr.msk.f32.vlgmr.msra.gmra.mxu0 %vm556_vm12, %v1567_v14 }
 0x217   : > { %1572 = vmatmul.mubr.msk.f32.vlgmr.msra.gmra.mxu1 %vm556_vm12, %v1568_v27 }
 0x2b4   : > { %v634_v31 = vpop.f32.mrf.mxu0 }
 0x2b5   : > { %v722_v44 = vadd.f32 %v721_v28, %v634_v31 }
 0x2b6   : > { %v636_v32 = vpop.f32.mrf.mxu0 }
 0x2b7   : > { %v724_v48 = vadd.f32 %v723_v29, %v636_v32 }
 0x2b9   : > { %v640_v34 = vpop.f32.mrf.mxu0 }
 0x2ba   : > { %v728_v4 = vadd.f32 %v727_v33, %v640_v34 }
 0x2bb   : > { %v642_v37 = vpop.f32.mrf.mxu0 }
 0x2bc   : > { %v730_v51 = vadd.f32 %v729_v35, %v642_v37 }
 0x2be   : > { %v983_v38 = vpop.f32.mrf.mxu1  ;;  %v850_v40 = vpop.f32.mrf.mxu0 }
 0x2bf   : > { %v861_v55 = vadd.f32 %v850_v40, %v722_v44 }
 0x2c0   : > { %v985_v41 = vpop.f32.mrf.mxu1  ;;  %v852_v43 = vpop.f32.mrf.mxu0 }
 0x2c1   : > { %v862_v57 = vadd.f32 %v852_v43, %v724_v48  ;;  %v994_v63 = vadd.f32 %v983_v38, %v861_v55 }
 0x2c3   : > { %v995_v42 = vadd.f32 %v985_v41, %v862_v57 }
 0x2c5   : > { %v856_v36 = vpop.f32.mrf.mxu0 }
 0x2c6   : > { %v989_v30 = vpop.f32.mrf.mxu1  ;;  %v863_v50 = vadd.f32 %v856_v36, %v728_v4 }
 0x2c7   : > { %v858_v47 = vpop.f32.mrf.mxu0 }
 0x2c8   : > { %v991_v45 = vpop.f32.mrf.mxu1  ;;  %v864_v61 = vadd.f32 %v858_v47, %v730_v51  ;;  %v996_v39 = vadd.f32 %v989_v30, %v863_v50 }
 0x2ca   : > { %v1249_v53 = vpop.f32.mrf.mxu1  ;;  %v997_v46 = vadd.f32 %v991_v45, %v864_v61 }
 0x2cc   : > { %v1251_v62 = vpop.f32.mrf.mxu1 }
 0x2cd   : > { %v1116_v59 = vpop.f32.mrf.mxu0 }
 0x2ce   : > { %v1127_v1 = vadd.f32 %v1116_v59, %v994_v63 }
 0x2cf   : > { %v1118_v0 = vpop.f32.mrf.mxu0 }
 0x2d0   : > { %v1128_v5 = vadd.f32 %v1118_v0, %v995_v42  ;;  %v1260_v10 = vadd.f32 %v1249_v53, %v1127_v1 }
 0x2d1   : > { %v1122_v2 = vpop.f32.mrf.mxu0 }
 0x2d2   : > { %v1129_v54 = vadd.f32 %v1122_v2, %v996_v39  ;;  %v1255_v3 = vpop.f32.mrf.mxu1  ;;  %v1261_v12 = vadd.f32 %v1251_v62, %v1128_v5 }
 0x2d3   : > { %v1124_v8 = vpop.f32.mrf.mxu0 }
 0x2d4   : > { %v1262_v58 = vadd.f32 %v1255_v3, %v1129_v54  ;;  %v1130_v56 = vadd.f32 %v1124_v8, %v997_v46  ;;  %v1257_v9 = vpop.f32.mrf.mxu1 }
 0x2d6   : > { %v1263_v6 = vadd.f32 %v1257_v9, %v1130_v56  ;;  %v1382_v11 = vpop.f32.mrf.mxu0 }
 0x2d7   : > { %v1393_v7 = vadd.f32 %v1382_v11, %v1260_v10  ;;  %v1388_v15 = vpop.f32.mrf.mxu1 }
 0x2d8   : > { %v1395_v16 = vadd.f32 %v1388_v15, %v1262_v58  ;;  %v1384_v18 = vpop.f32.mrf.mxu0 }
 0x2d9   : > { %1397 = vst [vmem:[%s178_s10] sm:$0xff] %v1393_v7  ;;  %v1394_v17 = vadd.f32 %v1384_v18, %v1261_v12  ;;  %v1390_v19 = vpop.f32.mrf.mxu1 }
 0x2da   : > { %1399 = vst [vmem:[%s178_s10 + $0x10] sm:$0xf] %v1395_v16  ;;  %v1396_v20 = vadd.f32 %v1390_v19, %v1263_v6  ;;  %v1404_v13 = vsel %vm563_vm6, %v1395_v16, 0.0 }
 0x2db   : > { %1398 = vst [vmem:[%s178_s10 + $0x8] sm:$0xff] %v1394_v17  ;;  %v1401_v21 = vadd.f32 %v1394_v17, %v1393_v7 }
 0x2dc   : > { %1400 = vst [vmem:[%s178_s10 + $0x18] sm:$0xf] %v1396_v20  ;;  %v1405_v22 = vsel %vm563_vm6, %v1396_v20, 0.0 }
 0x2dd   : > { %1402 = vadd.xlane.f32.xlu1 %v1401_v21  ;;  %v1406_v23 = vadd.f32 %v1405_v22, %v1404_v13 }
 0x2df   : > { %1407 = vadd.xlane.f32.xlu0 %v1406_v23 }
 0x366   : > { %v1403_v24 = vpop.xlane.xlu1 %1402 }
 0x367   : > { %v1409_v49 = vmul.f32 0.00390625, %v1403_v24 }
 0x368   : > { %v1408_v52 = vpop.xlane.xlu0 %1407 }
 0x369   : > { %v1411_v60 = vsub.f32 %v1393_v7, %v1409_v49  ;;  %v1412_v25 = vsub.f32 %v1394_v17, %v1409_v49  ;;  %v1410_v14 = vmul.f32 0.00390625, %v1408_v52 }
 0x36b   : > { %v1415_v26 = vmul.f32 %v1411_v60, %v1411_v60  ;;  %v1416_v27 = vmul.f32 %v1412_v25, %v1412_v25  ;;  %v1413_v28 = vsub.f32 %v1395_v16, %v1410_v14  ;;  %v1414_v29 = vsub.f32 %v1396_v20, %v1410_v14 }
 0x36d   : > { %v1417_v31 = vmul.f32 %v1413_v28, %v1413_v28  ;;  %v1418_v32 = vmul.f32 %v1414_v29, %v1414_v29  ;;  %v1419_v33 = vadd.f32 %v1416_v27, %v1415_v26 }
 0x36f   : > { %1420 = vadd.xlane.f32.xlu0 %v1419_v33  ;;  %v1422_v34 = vsel %vm563_vm6, %v1417_v31, 0.0  ;;  %v1423_v35 = vsel %vm563_vm6, %v1418_v32, 0.0 }
 0x370   : > { %v1424_v37 = vadd.f32 %v1423_v35, %v1422_v34 }
 0x373   : > { %1425 = vadd.xlane.f32.xlu0 %v1424_v37 }
 0x3f8   : > { %v1421_v38 = vpop.xlane.xlu0 %1420 }
 0x3f9   : > { %v1428_v40 = vsel %vm1427_vm3, %v1403_v24, %v1421_v38 }
 0x3fa   : > { %1431 = vst.msk [vmem:[%s183_s16] sm:$0xff] %vm1430_vm5, %v1428_v40 }
 0x3fc   : > { %v1426_v41 = vpop.xlane.xlu0 %1425 }
 0x3fd   : > { %v1429_v43 = vsel %vm1427_vm3, %v1408_v52, %v1426_v41 }
 0x3fe   : > { %1433 = vst.msk [vmem:[%s183_s16 + $0x8] sm:$0xf] %vm1432_vm7, %v1429_v43 }
 0x3ff PF: > { %s14_s12 = sadd.s32 1, %s1615_s12  }
 0x400   : > { %p11_p4 = scmp.ge.s32.totalorder %s14_s12, 4  }
 0x402   :  { %13 = sbr.rel (!%p11_p4) target bundleno = 1 (0x1), region = 76 }

</bundles_post_ra>
